<compile_context>
chip_gen: v6e
topology: v6e:2x2x1
jax: 0.10.0
libtpu: 0.0.40
codegen_flags: <defaults>
</compile_context>

<pallas_src>
import math
import functools

import jax
import jax.numpy as jnp
from jax import lax
from jax.experimental import pallas as pl
from jax.experimental.pallas import tpu as pltpu


LN_EPS = 1e-12
NEG_INF = -1e30


def _layernorm(x, w, b, eps):
    mu = jnp.mean(x, axis=-1, keepdims=True)
    var = jnp.mean((x - mu) ** 2, axis=-1, keepdims=True)
    return (x - mu) * lax.rsqrt(var + eps) * w + b


# ---------------------------------------------------------------------------
# Kernel 1: pre-attention LayerNorm + fused K|V projection (streamed over S).
# ---------------------------------------------------------------------------
def kv_proj_kernel(hidden_ref, ln1_w_ref, ln1_b_ref, wkv_ref, bkv_ref, kv_ref):
    # hidden_ref: (TS, D) f32   wkv_ref: (D, 2D) bf16   kv_ref: (TS, 2D) bf16
    h1 = _layernorm(hidden_ref[...], ln1_w_ref[0], ln1_b_ref[0], LN_EPS)
    kv = jnp.dot(h1.astype(jnp.bfloat16), wkv_ref[...],
                 preferred_element_type=jnp.float32) + bkv_ref[0]
    kv_ref[...] = kv.astype(jnp.bfloat16)


# ---------------------------------------------------------------------------
# Kernel 2: attention (per query tile) + merge + residual + FFN + residual.
# ---------------------------------------------------------------------------
def encoder_layer_kernel(
    hidden_ref,                  # (TQ, D)      f32  — query tile (residual path)
    kv_ref,                      # (S_pad, 2D)  bf16 — [K | V] for the whole sequence
    ln1_w_ref, ln1_b_ref,        # (1, D) f32
    wq_ref, bq_ref,              # (D, D) bf16, (1, D) f32
    merge_w_ref, merge_b_ref,    # (D, D) bf16, (1, D) f32
    ln2_w_ref, ln2_b_ref,        # (1, D) f32
    w1_ref, b1_ref,              # (D, F) bf16, (1, F) f32
    w2_ref, b2_ref,              # (F, D) bf16, (1, D) f32
    out_ref,                     # (TQ, D)
    ctx_ref,                     # VMEM scratch (TQ, D) f32 — per-head context columns
    *, n_heads, s_actual,
):
    tq, D = hidden_ref.shape
    s_pad = kv_ref.shape[0]
    dh = D // n_heads
    scale = 1.0 / math.sqrt(dh)

    # ---- per-tile Q projection (K/V come precomputed from kernel 1) ----
    x_t = hidden_ref[...]                                          # (TQ, D) f32
    h1_t = _layernorm(x_t, ln1_w_ref[0], ln1_b_ref[0], LN_EPS)
    q_t = jnp.dot(h1_t.astype(jnp.bfloat16), wq_ref[...],
                  preferred_element_type=jnp.float32) + bq_ref[0]
    q_t = (q_t * scale).astype(jnp.bfloat16)                       # fold 1/sqrt(dh) into Q

    # Mask for padded key positions (s_actual is a compile-time constant).
    if s_actual < s_pad:
        key_valid = lax.broadcasted_iota(jnp.int32, (tq, s_pad), 1) < s_actual
    else:
        key_valid = None

    # ---- per-head attention; context written straight into a VMEM scratch ----
    # Static Python loop => all slice offsets are compile-time constants; no value
    # accumulator is carried across iterations (each head's intermediates die on the
    # ctx_ref store), so live ranges stay bounded.
    for h in range(n_heads):
        lo = h * dh
        qh = q_t[:, lo:lo + dh]                                    # (TQ, dh)  bf16
        kh = kv_ref[:, pl.ds(lo, dh)]                              # (S_pad, dh) bf16 (ref slice)
        vh = kv_ref[:, pl.ds(D + lo, dh)]                          # (S_pad, dh) bf16 (ref slice)
        s = lax.dot_general(qh, kh, (((1,), (1,)), ((), ())),
                            preferred_element_type=jnp.float32)    # (TQ, S_pad) f32
        # TODO(synk): additive attention_mask support would be `s = s + mask` here.
        if key_valid is not None:
            s = jnp.where(key_valid, s, NEG_INF)
        s = s - jnp.max(s, axis=-1, keepdims=True)
        p = jnp.exp(s)
        p = p * pl.reciprocal(jnp.sum(p, axis=-1, keepdims=True), approx=True)
        ctx_ref[:, pl.ds(lo, dh)] = jnp.dot(p.astype(jnp.bfloat16), vh,
                                            preferred_element_type=jnp.float32)

    # ---- single merge matmul (contraction K = D -> full MXU fill) + residual ----
    attn = jnp.dot(ctx_ref[...].astype(jnp.bfloat16), merge_w_ref[...],
                   preferred_element_type=jnp.float32) + merge_b_ref[0]
    r1 = attn + x_t                                                # f32 residual

    # ---- pre-FFN LayerNorm + FFN (exact erf gelu, matches torch) + residual ----
    h2 = _layernorm(r1, ln2_w_ref[0], ln2_b_ref[0], LN_EPS)
    ff = jnp.dot(h2.astype(jnp.bfloat16), w1_ref[...],
                 preferred_element_type=jnp.float32) + b1_ref[0]
    ff = jax.nn.gelu(ff, approximate=False)
    ff = jnp.dot(ff.astype(jnp.bfloat16), w2_ref[...],
                 preferred_element_type=jnp.float32) + b2_ref[0]

    out_ref[...] = (ff + r1).astype(out_ref.dtype)


# ---------------------------------------------------------------------------
# Wrapper
# ---------------------------------------------------------------------------
def _device_kind():
    try:
        return jax.devices()[0].device_kind.lower()
    except Exception:
        return ""


def _round_up(x, m):
    return (x + m - 1) // m * m


def pre_ln_encoder_layer(hidden, params, n_heads):
    B, S, D = hidden.shape
    F = params["w1"].shape[1]
    assert D % n_heads == 0

    kind = _device_kind()
    is_v7 = "v7" in kind
    # v5e/v6e have 128 MiB physical VMEM; v7x has 64 MiB per TensorCore.
    vmem_cap = (56 << 20) if is_v7 else (100 << 20)

    # Pad sequence to a multiple of 128 and use only 128/256 query tiles.
    S_pad = _round_up(S, 128)
    tq = 128 if (is_v7 or S_pad % 256 != 0) else 256
    tq = min(tq, S_pad)
    n_qt = S_pad // tq
    ts = tq                                   # sequence tile for the K/V projection pass

    hidden_p = hidden if S_pad == S else jnp.pad(hidden, ((0, 0), (0, S_pad - S), (0, 0)))

    cdt = jnp.bfloat16                        # MXU operand dtype; accumulation stays f32
    wq = params["wq"].astype(cdt)
    wkv = jnp.concatenate([params["wk"], params["wv"]], axis=1).astype(cdt)
    bkv = jnp.concatenate([params["bk"], params["bv"]], axis=1).astype(jnp.float32)
    merge_w = params["merge_w"].astype(cdt)
    w1 = params["w1"].astype(cdt)
    w2 = params["w2"].astype(cdt)

    def const_spec(shape):
        nd = len(shape)
        return pl.BlockSpec(shape, lambda b, q, _nd=nd: (0,) * _nd)

    # ------------------------- pass 1: K|V projection -------------------------
    kv_weight_bytes = wkv.size * 2
    kv_vmem = 2 * (kv_weight_bytes + 2 * ts * D * 4 + 2 * ts * 2 * D * 2) + (8 << 20)
    kv_vmem = int(min(max(kv_vmem, 32 << 20), vmem_cap))

    kv = pl.pallas_call(
        kv_proj_kernel,
        out_shape=jax.ShapeDtypeStruct((B, S_pad, 2 * D), cdt),
        grid_spec=pltpu.PrefetchScalarGridSpec(
            num_scalar_prefetch=0,
            grid=(B, S_pad // ts),
            in_specs=[
                pl.BlockSpec((None, ts, D), lambda b, s: (b, s, 0)),
                const_spec((1, D)), const_spec((1, D)),               # ln1 w, b
                const_spec((D, 2 * D)), const_spec((1, 2 * D)),       # fused [Wk|Wv], bias
            ],
            out_specs=pl.BlockSpec((None, ts, 2 * D), lambda b, s: (b, s, 0)),
        ),
        compiler_params=pltpu.CompilerParams(
            dimension_semantics=("parallel", "parallel"),
            vmem_limit_bytes=kv_vmem),
        cost_estimate=pl.CostEstimate(
            flops=int(B * 2 * S_pad * D * 2 * D),
            transcendentals=0,
            bytes_accessed=int(kv_weight_bytes + B * S_pad * (D * 4 + 2 * D * 2))),
    )(hidden_p, params["ln1_w"], params["ln1_b"], wkv, bkv)

    # ----------------------- pass 2: attention + merge + FFN ------------------
    kernel = functools.partial(encoder_layer_kernel, n_heads=n_heads, s_actual=S)

    in_specs = [
        pl.BlockSpec((None, tq, D), lambda b, q: (b, q, 0)),          # query tile
        pl.BlockSpec((None, S_pad, 2 * D), lambda b, q: (b, 0, 0)),   # K|V (per batch, const over q)
        const_spec((1, D)), const_spec((1, D)),                       # ln1 w, b
        const_spec((D, D)), const_spec((1, D)),                       # wq, bq
        const_spec((D, D)), const_spec((1, D)),                       # merge w, b
        const_spec((1, D)), const_spec((1, D)),                       # ln2 w, b
        const_spec((D, F)), const_spec((1, F)),                       # ffn w1, b1
        const_spec((F, D)), const_spec((1, D)),                       # ffn w2, b2
    ]

    weight_bytes = (wq.size + merge_w.size + w1.size + w2.size) * 2
    kvblk_bytes = S_pad * 2 * D * 2
    io_bytes = 2 * tq * D * 4
    act_bytes = (3 * tq * S_pad + tq * F + 8 * tq * D) * 4
    vmem_limit = int(min(max(2 * (weight_bytes + kvblk_bytes + io_bytes) + act_bytes + (8 << 20),
                             32 << 20), vmem_cap))

    flops = int(B * (2 * S_pad * D * D          # Q projection
                     + 4 * S_pad * S_pad * D    # QK^T + P@V (summed over heads)
                     + 2 * S_pad * D * D        # merge
                     + 4 * S_pad * D * F))      # FFN
    transcendentals = int(B * S_pad * (n_heads * S_pad + F))
    bytes_accessed = int(weight_bytes + B * (2 * S_pad * D * 4 + S_pad * 2 * D * 2))

    out_p = pl.pallas_call(
        kernel,
        out_shape=jax.ShapeDtypeStruct((B, S_pad, D), hidden.dtype),
        grid_spec=pltpu.PrefetchScalarGridSpec(
            num_scalar_prefetch=0,
            grid=(B, n_qt),
            in_specs=in_specs,
            out_specs=pl.BlockSpec((None, tq, D), lambda b, q: (b, q, 0)),
            scratch_shapes=[pltpu.VMEM((tq, D), jnp.float32)],        # per-head context
        ),
        compiler_params=pltpu.CompilerParams(
            dimension_semantics=("parallel", "parallel"),             # no cross-tile state
            vmem_limit_bytes=vmem_limit),
        cost_estimate=pl.CostEstimate(
            flops=flops, transcendentals=transcendentals, bytes_accessed=bytes_accessed),
    )(
        hidden_p, kv,
        params["ln1_w"], params["ln1_b"],
        wq, params["bq"],
        merge_w, params["merge_b"],
        params["ln2_w"], params["ln2_b"],
        w1, params["b1"],
        w2, params["b2"],
    )

    return out_p[:, :S, :] if S_pad != S else out_p


# ---------------------------------------------------------------------------
# Pure-JAX f32 reference mirroring the PyTorch forward (dropout = identity)
# ---------------------------------------------------------------------------
def _reference(hidden, params, n_heads):
    B, S, D = hidden.shape
    dh = D // n_heads

    def ln(x, w, b):
        mu = jnp.mean(x, -1, keepdims=True)
        var = jnp.mean((x - mu) ** 2, -1, keepdims=True)
        return (x - mu) / jnp.sqrt(var + LN_EPS) * w[0] + b[0]

    h1 = ln(hidden, params["ln1_w"], params["ln1_b"])
    q = h1 @ params["wq"] + params["bq"][0]
    k = h1 @ params["wk"] + params["bk"][0]
    v = h1 @ params["wv"] + params["bv"][0]
    q = q.reshape(B, S, n_heads, dh).transpose(0, 2, 1, 3)
    k = k.reshape(B, S, n_heads, dh).transpose(0, 2, 1, 3)
    v = v.reshape(B, S, n_heads, dh).transpose(0, 2, 1, 3)
    scores = jnp.einsum("bhqd,bhkd->bhqk", q, k) / math.sqrt(dh)
    p = jax.nn.softmax(scores, axis=-1)
    ctx = jnp.einsum("bhqk,bhkd->bhqd", p, v).transpose(0, 2, 1, 3).reshape(B, S, D)
    merged = ctx @ params["merge_w"] + params["merge_b"][0]
    r1 = merged + hidden
    h2 = ln(r1, params["ln2_w"], params["ln2_b"])
    ff = jax.nn.gelu(h2 @ params["w1"] + params["b1"][0], approximate=False)
    ff = ff @ params["w2"] + params["b2"][0]
    return ff + r1


def init_params(key, d_model, dim_feedforward):
    keys = jax.random.split(key, 12)
    s = 0.02

    def lin(k, din, dout):
        return jax.random.normal(k, (din, dout), jnp.float32) * s

    return {
        "ln1_w": jnp.ones((1, d_model), jnp.float32),
        "ln1_b": jnp.zeros((1, d_model), jnp.float32),
        "wq": lin(keys[0], d_model, d_model),
        "bq": jax.random.normal(keys[1], (1, d_model), jnp.float32) * s,
        "wk": lin(keys[2], d_model, d_model),
        "bk": jax.random.normal(keys[3], (1, d_model), jnp.float32) * s,
        "wv": lin(keys[4], d_model, d_model),
        "bv": jax.random.normal(keys[5], (1, d_model), jnp.float32) * s,
        "merge_w": lin(keys[6], d_model, d_model),
        "merge_b": jax.random.normal(keys[7], (1, d_model), jnp.float32) * s,
        "ln2_w": jnp.ones((1, d_model), jnp.float32),
        "ln2_b": jnp.zeros((1, d_model), jnp.float32),
        "w1": lin(keys[8], d_model, dim_feedforward),
        "b1": jax.random.normal(keys[9], (1, dim_feedforward), jnp.float32) * s,
        "w2": lin(keys[10], dim_feedforward, d_model),
        "b2": jax.random.normal(keys[11], (1, d_model), jnp.float32) * s,
    }


if __name__ == "__main__":
    B, S = 2, 8
    d_model, n_heads, dim_feedforward = 32, 4, 64

    key = jax.random.PRNGKey(0)
    k_x, k_p = jax.random.split(key)
    hidden = jax.random.normal(k_x, (B, S, d_model), jnp.float32)
    params = init_params(k_p, d_model, dim_feedforward)

    out = pre_ln_encoder_layer(hidden, params, n_heads)
    out = jax.block_until_ready(out)

    ref = _reference(hidden, params, n_heads)
    assert out.shape == (B, S, d_model)
    # bf16 MXU operands + approx softmax reciprocal vs. pure-f32 reference.
    assert jnp.allclose(out, ref, atol=1e-2, rtol=1e-2), float(jnp.max(jnp.abs(out - ref)))

    print("KERNEL_OK")
</pallas_src>

<mosaic_0001>
module attributes {stable_mosaic.version = 11 : i64} {
  func.func @kv_proj_kernel(%arg0: i32, %arg1: i32, %arg2: memref<1x128x32xf32, #tpu.memory_space<vmem>>, %arg3: memref<1x32xf32, #tpu.memory_space<vmem>>, %arg4: memref<1x32xf32, #tpu.memory_space<vmem>>, %arg5: memref<32x64xbf16, #tpu.memory_space<vmem>>, %arg6: memref<1x64xf32, #tpu.memory_space<vmem>>, %arg7: memref<1x128x64xbf16, #tpu.memory_space<vmem>>) attributes {dimension_semantics = [#tpu.dimension_semantics<parallel>, #tpu.dimension_semantics<parallel>], iteration_bounds = array<i64: 2, 1>, scalar_prefetch = 0 : i64, scratch_operands = 0 : i64, tpu.core_type = #tpu.core_type<tc>, window_params = [{transform_indices = @transform_0, window_bounds = array<i64: 1, 128, 32>}, {pipeline_mode = #tpu.pipeline_mode<synchronous>, transform_indices = @transform_1, window_bounds = array<i64: 1, 32>}, {pipeline_mode = #tpu.pipeline_mode<synchronous>, transform_indices = @transform_2, window_bounds = array<i64: 1, 32>}, {pipeline_mode = #tpu.pipeline_mode<synchronous>, transform_indices = @transform_3, window_bounds = array<i64: 32, 64>}, {pipeline_mode = #tpu.pipeline_mode<synchronous>, transform_indices = @transform_4, window_bounds = array<i64: 1, 64>}, {transform_indices = @transform_5, window_bounds = array<i64: 1, 128, 64>}]} {
    %c0 = arith.constant 0 : index
    %c0_0 = arith.constant 0 : index
    %c0_1 = arith.constant 0 : index
    %0 = vector.load %arg2[%c0, %c0_0, %c0_1] : memref<1x128x32xf32, #tpu.memory_space<vmem>>, vector<1x128x32xf32>
    %1 = vector.shape_cast %0 : vector<1x128x32xf32> to vector<128x32xf32>
    %c0_2 = arith.constant 0 : index
    %c0_3 = arith.constant 0 : index
    %2 = vector.load %arg3[%c0_2, %c0_3] : memref<1x32xf32, #tpu.memory_space<vmem>>, vector<1x32xf32>
    %3 = vector.shape_cast %2 : vector<1x32xf32> to vector<32xf32>
    %c0_4 = arith.constant 0 : index
    %c0_5 = arith.constant 0 : index
    %4 = vector.load %arg4[%c0_4, %c0_5] : memref<1x32xf32, #tpu.memory_space<vmem>>, vector<1x32xf32>
    %5 = vector.shape_cast %4 : vector<1x32xf32> to vector<32xf32>
    %cst = arith.constant dense<0.000000e+00> : vector<128xf32>
    %6 = vector.multi_reduction <add>, %1, %cst [1] : vector<128x32xf32> to vector<128xf32>
    %7 = vector.shape_cast %6 : vector<128xf32> to vector<128x1xf32>
    %cst_6 = arith.constant 3.200000e+01 : f32
    %8 = vector.broadcast %cst_6 : f32 to vector<128x1xf32>
    %9 = arith.divf %7, %8 : vector<128x1xf32>
    %10 = vector.broadcast %9 : vector<128x1xf32> to vector<128x32xf32>
    %11 = arith.subf %1, %10 : vector<128x32xf32>
    %12 = arith.mulf %11, %11 : vector<128x32xf32>
    %cst_7 = arith.constant dense<0.000000e+00> : vector<128xf32>
    %13 = vector.multi_reduction <add>, %12, %cst_7 [1] : vector<128x32xf32> to vector<128xf32>
    %14 = vector.shape_cast %13 : vector<128xf32> to vector<128x1xf32>
    %cst_8 = arith.constant 3.200000e+01 : f32
    %15 = vector.broadcast %cst_8 : f32 to vector<128x1xf32>
    %16 = arith.divf %14, %15 : vector<128x1xf32>
    %17 = vector.broadcast %9 : vector<128x1xf32> to vector<128x32xf32>
    %18 = arith.subf %1, %17 : vector<128x32xf32>
    %cst_9 = arith.constant 9.99999996E-13 : f32
    %19 = vector.broadcast %cst_9 : f32 to vector<128x1xf32>
    %20 = arith.addf %16, %19 : vector<128x1xf32>
    %21 = math.rsqrt %20 : vector<128x1xf32>
    %22 = vector.broadcast %21 : vector<128x1xf32> to vector<128x32xf32>
    %23 = arith.mulf %18, %22 : vector<128x32xf32>
    %24 = vector.shape_cast %3 : vector<32xf32> to vector<1x32xf32>
    %25 = vector.broadcast %24 : vector<1x32xf32> to vector<128x32xf32>
    %26 = arith.mulf %23, %25 : vector<128x32xf32>
    %27 = vector.shape_cast %5 : vector<32xf32> to vector<1x32xf32>
    %28 = vector.broadcast %27 : vector<1x32xf32> to vector<128x32xf32>
    %29 = arith.addf %26, %28 : vector<128x32xf32>
    %30 = arith.truncf %29 : vector<128x32xf32> to vector<128x32xbf16>
    %c0_10 = arith.constant 0 : index
    %c0_11 = arith.constant 0 : index
    %31 = vector.load %arg5[%c0_10, %c0_11] : memref<32x64xbf16, #tpu.memory_space<vmem>>, vector<32x64xbf16>
    %cst_12 = arith.constant dense<0.000000e+00> : vector<128x64xf32>
    %32 = tpu.matmul %30, %31, %cst_12 {dimension_numbers = #tpu.dot_dimension_numbers<[1], [0], [0], [1], [0, 0, 1, 1], [], []>} : vector<128x32xbf16>, vector<32x64xbf16>, vector<128x64xf32> -> vector<128x64xf32>
    %c0_13 = arith.constant 0 : index
    %c0_14 = arith.constant 0 : index
    %33 = vector.load %arg6[%c0_13, %c0_14] : memref<1x64xf32, #tpu.memory_space<vmem>>, vector<1x64xf32>
    %34 = vector.shape_cast %33 : vector<1x64xf32> to vector<64xf32>
    %35 = vector.shape_cast %34 : vector<64xf32> to vector<1x64xf32>
    %36 = vector.broadcast %35 : vector<1x64xf32> to vector<128x64xf32>
    %37 = arith.addf %32, %36 : vector<128x64xf32>
    %38 = arith.truncf %37 : vector<128x64xf32> to vector<128x64xbf16>
    %c0_15 = arith.constant 0 : index
    %c0_16 = arith.constant 0 : index
    %c0_17 = arith.constant 0 : index
    %39 = vector.load %arg7[%c0_15, %c0_16, %c0_17] : memref<1x128x64xbf16, #tpu.memory_space<vmem>>, vector<1x128x64xbf16>
    %40 = vector.shape_cast %39 : vector<1x128x64xbf16> to vector<128x64xbf16>
    %41 = vector.shape_cast %38 : vector<128x64xbf16> to vector<1x128x64xbf16>
    tpu.vector_store %arg7[%c0_15, %c0_16, %c0_17], %41 {strides = array<i32>} : memref<1x128x64xbf16, #tpu.memory_space<vmem>>, vector<1x128x64xbf16>,
    return
  }
  func.func @transform_0(%arg0: i32, %arg1: i32) -> (i32, i32, i32) {
    %c0_i32 = arith.constant 0 : i32
    %c0_i32_0 = arith.constant 0 : i32
    return %arg0, %arg1, %c0_i32 : i32, i32, i32
  }
  func.func @transform_1(%arg0: i32, %arg1: i32) -> (i32, i32) {
    %c0_i32 = arith.constant 0 : i32
    %c0_i32_0 = arith.constant 0 : i32
    %c0_i32_1 = arith.constant 0 : i32
    return %c0_i32, %c0_i32_0 : i32, i32
  }
  func.func @transform_2(%arg0: i32, %arg1: i32) -> (i32, i32) {
    %c0_i32 = arith.constant 0 : i32
    %c0_i32_0 = arith.constant 0 : i32
    %c0_i32_1 = arith.constant 0 : i32
    return %c0_i32, %c0_i32_0 : i32, i32
  }
  func.func @transform_3(%arg0: i32, %arg1: i32) -> (i32, i32) {
    %c0_i32 = arith.constant 0 : i32
    %c0_i32_0 = arith.constant 0 : i32
    %c0_i32_1 = arith.constant 0 : i32
    return %c0_i32, %c0_i32_0 : i32, i32
  }
  func.func @transform_4(%arg0: i32, %arg1: i32) -> (i32, i32) {
    %c0_i32 = arith.constant 0 : i32
    %c0_i32_0 = arith.constant 0 : i32
    %c0_i32_1 = arith.constant 0 : i32
    return %c0_i32, %c0_i32_0 : i32, i32
  }
  func.func @transform_5(%arg0: i32, %arg1: i32) -> (i32, i32, i32) {
    %c0_i32 = arith.constant 0 : i32
    %c0_i32_0 = arith.constant 0 : i32
    return %arg0, %arg1, %c0_i32 : i32, i32, i32
  }
}

</mosaic_0001>

<bundles_post_ra>
// kernel: tpu_custom_call.1
= control target key start
LH: loop header
LB: loop body
LE: loop exit
PB: predicated region body
PF: predicated region fallthrough
CT: control target
= control target key end

     0   :  { %s1061_s18 = smov 0   ;;  %s1063_s19 = smov 0   ;;  %s1379_s0 = inlined_call_operand.vmem [shape: f32[2,128,32], index: 0, kind: input, shape index: {}]   ;;  %s1380_s1 = inlined_call_operand.vmem [shape: f32[1,32], index: 1, kind: input, shape index: {}]   ;;  %s1381_s2 = inlined_call_operand.vmem [shape: f32[1,32], index: 2, kind: input, shape index: {}]   ;;  %s1382_s3 = inlined_call_operand.vmem [shape: bf16[32,64], index: 3, kind: input, shape index: {}]   ;;  %s1383_s4 = inlined_call_operand.vmem [shape: f32[1,64], index: 4, kind: input, shape index: {}]   ;;  %s1384_s5 = inlined_call_operand.vmem [shape: bf16[2,128,64], index: 5, kind: output, shape index: {}]  }
   0x1   :  { %s1065_s20 = smov 0  }
   0x2 LB: > { %s27_s21 = sadd.s32 1, %s1025_s19  ;;  %p861_p0 = scmp.ge.s32.totalorder %s1029_s20, 1  ;;  %s1029_s20 = sphi %s1065_s20, %s15_s20   ;;  %s1025_s19 = sphi %s1063_s19, %s1386_s19   ;;  %s1021_s18 = sphi %s1061_s18, %s1385_s18  }
   0x3   : > { %p29_p1 = scmp.ge.s32.totalorder %s27_s21, 2  ;;  %p208_p2 = scmp.lt.s32.totalorder %s1029_s20, 3 }
   0x5   : > { %s1388_s21 = smov (%p29_p1, %s27_s21), 0  ;;  %p209_p3 = pnand %p861_p0, %p208_p2 }
   0x6   : > { %p245_p4 = scmp.lt.s32.totalorder (!%p209_p3), %s1021_s18, 1 }
   0x7   : > { %212 = sbr.rel (%p209_p3) target bundleno = 562 (0x232), region = 40 }
   0xc   : > { %s1390_s18 = smov (!%p245_p4, %s1021_s18), 1  ;;  %vm283_vm0 = vcmask 261120   ;;  %vm753_vm1 = vcmask 519168  }
   0xd   : > { %s897_s22 = sshll.u32 %s1390_s18, 7  ;;  %s898_s11 = sshll.u32 %s1390_s18, 6 }
   0xe   : > { %s1085_s25 = scalar_lea.vmem %s1379_s0, %s897_s22  ;;  %s1321_s14 = scalar_lea.vmem %s1384_s5, %s898_s11 }
   0xf   : > { %v265_v0 = vld [vmem:[%s1085_s25] sm:$0xff]  ;;  %v266_v2 = vld [vmem:[%s1085_s25 + $0x8] sm:$0xff]  ;;  %v267_v8 = vld [vmem:[%s1085_s25 + $0x10] sm:$0xff] }
  0x10   : > { %v273_v1 = vld [vmem:[%s1085_s25 + $0x40] sm:$0xff]  ;;  %v284_v3 = vsel %vm283_vm0, %v265_v0, 0.0  ;;  %v274_v5 = vld [vmem:[%s1085_s25 + $0x48] sm:$0xff]  ;;  %v287_v6 = vsel %vm283_vm0, %v266_v2, 0.0  ;;  %v268_v9 = vld [vmem:[%s1085_s25 + $0x18] sm:$0xff]  ;;  %v290_v10 = vsel %vm283_vm0, %v267_v8, 0.0 }
  0x11   : > { %v308_v4 = vsel %vm283_vm0, %v273_v1, 0.0  ;;  %285 = vadd.xlane.f32.xlu0 %v284_v3  ;;  %v311_v7 = vsel %vm283_vm0, %v274_v5, 0.0  ;;  %v293_v11 = vsel %vm283_vm0, %v268_v9, 0.0  ;;  %v1100_v12 = vld [vmem:[%s1085_s25 + $0x50] sm:$0xff]  ;;  %v1103_v13 = vld [vmem:[%s1085_s25 + $0x58] sm:$0xff]  ;;  %v1110_v16 = vld [vmem:[%s1085_s25 + $0x20] sm:$0xff] }
  0x12   : > { %309 = vadd.xlane.f32.xlu1 %v308_v4  ;;  %v314_v14 = vsel %vm283_vm0, %v1100_v12, 0.0  ;;  %v317_v15 = vsel %vm283_vm0, %v1103_v13, 0.0  ;;  %v1113_v17 = vld [vmem:[%s1085_s25 + $0x28] sm:$0xff]  ;;  %v296_v18 = vsel %vm283_vm0, %v1110_v16, 0.0  ;;  %v1120_v20 = vld [vmem:[%s1085_s25 + $0x60] sm:$0xff]  ;;  %v1130_v24 = vld [vmem:[%s1085_s25 + $0x30] sm:$0xff] }
  0x13   : > { %v299_v19 = vsel %vm283_vm0, %v1113_v17, 0.0  ;;  %v1123_v21 = vld [vmem:[%s1085_s25 + $0x68] sm:$0xff]  ;;  %v320_v22 = vsel %vm283_vm0, %v1120_v20, 0.0  ;;  %v1133_v25 = vld [vmem:[%s1085_s25 + $0x38] sm:$0xff]  ;;  %v302_v26 = vsel %vm283_vm0, %v1130_v24, 0.0  ;;  %v1140_v28 = vld [vmem:[%s1085_s25 + $0x70] sm:$0xff] }
  0x14   : > { %v323_v23 = vsel %vm283_vm0, %v1123_v21, 0.0  ;;  %v305_v27 = vsel %vm283_vm0, %v1133_v25, 0.0  ;;  %v1143_v29 = vld [vmem:[%s1085_s25 + $0x78] sm:$0xff]  ;;  %v326_v30 = vsel %vm283_vm0, %v1140_v28, 0.0 }
  0x15   : > { %288 = vadd.xlane.f32.xlu0 %v287_v6  ;;  %v329_v31 = vsel %vm283_vm0, %v1143_v29, 0.0 }
  0x16   : > { %312 = vadd.xlane.f32.xlu1 %v311_v7 }
  0x19   : > { %291 = vadd.xlane.f32.xlu0 %v290_v10 }
  0x1a   : > { %294 = vadd.xlane.f32.xlu1 %v293_v11 }
  0x1d   : > { %315 = vadd.xlane.f32.xlu0 %v314_v14 }
  0x1e   : > { %318 = vadd.xlane.f32.xlu1 %v317_v15 }
  0x21   : > { %297 = vadd.xlane.f32.xlu0 %v296_v18 }
  0x22   : > { %300 = vadd.xlane.f32.xlu1 %v299_v19 }
  0x25   : > { %321 = vadd.xlane.f32.xlu0 %v320_v22 }
  0x26   : > { %324 = vadd.xlane.f32.xlu1 %v323_v23 }
  0x29   : > { %303 = vadd.xlane.f32.xlu0 %v302_v26 }
  0x2a   : > { %306 = vadd.xlane.f32.xlu1 %v305_v27 }
  0x2d   : > { %327 = vadd.xlane.f32.xlu0 %v326_v30 }
  0x2e   : > { %330 = vadd.xlane.f32.xlu1 %v329_v31 }
  0x9a   : > { %v286_v32 = vpop.xlane.xlu0 %285 }
  0x9b   : > { %v310_v33 = vpop.xlane.xlu1 %309  ;;  %v333_v34 = vmul.f32 0.03125, %v286_v32 }
  0x9c   : > { %v341_v35 = vmul.f32 0.03125, %v310_v33 }
  0x9d   : > { %v1149_v36 = vsub.f32 %v265_v0, %v333_v34 }
  0x9e   : > { %v1151_v37 = vsub.f32 %v273_v1, %v341_v35  ;;  %v289_v38 = vpop.xlane.xlu0 %288 }
  0x9f   : > { %v313_v39 = vpop.xlane.xlu1 %312  ;;  %v334_v40 = vmul.f32 0.03125, %v289_v38  ;;  %v365_v42 = vmul.f32 %v1149_v36, %v1149_v36 }
  0xa0   : > { %v342_v41 = vmul.f32 0.03125, %v313_v39  ;;  %v373_v43 = vmul.f32 %v1151_v37, %v1151_v37 }
  0xa1   : > { %v1157_v44 = vsub.f32 %v266_v2, %v334_v40  ;;  %v381_v46 = vsel %vm283_vm0, %v365_v42, 0.0 }
  0xa2   : > { %v1159_v45 = vsub.f32 %v274_v5, %v342_v41  ;;  %382 = vadd.xlane.f32.xlu0 %v381_v46  ;;  %v292_v47 = vpop.xlane.xlu0 %291  ;;  %v405_v49 = vsel %vm283_vm0, %v373_v43, 0.0 }
  0xa3   : > { %v295_v48 = vpop.xlane.xlu1 %294  ;;  %v335_v50 = vmul.f32 0.03125, %v292_v47  ;;  %v366_v52 = vmul.f32 %v1157_v44, %v1157_v44 }
  0xa4   : > { %v336_v51 = vmul.f32 0.03125, %v295_v48  ;;  %v374_v53 = vmul.f32 %v1159_v45, %v1159_v45 }
  0xa5   : > { %v1167_v54 = vsub.f32 %v267_v8, %v335_v50  ;;  %v384_v56 = vsel %vm283_vm0, %v366_v52, 0.0 }
  0xa6   : > { %v1169_v55 = vsub.f32 %v268_v9, %v336_v51  ;;  %406 = vadd.xlane.f32.xlu0 %v405_v49  ;;  %385 = vadd.xlane.f32.xlu1 %v384_v56  ;;  %v316_v57 = vpop.xlane.xlu0 %315  ;;  %v408_v59 = vsel %vm283_vm0, %v374_v53, 0.0  ;;  %v974_v53 = vld [vmem:[%s1382_s3] sm:$0xff]  }
  0xa7   : > { %v319_v58 = vpop.xlane.xlu1 %318  ;;  %v343_v60 = vmul.f32 0.03125, %v316_v57  ;;  %v367_v62 = vmul.f32 %v1167_v54, %v1167_v54 }
  0xa8   : > { %v344_v61 = vmul.f32 0.03125, %v319_v58  ;;  %v368_v63 = vmul.f32 %v1169_v55, %v1169_v55 }
  0xa9   : > { %v1178_v0 = vsub.f32 %v1100_v12, %v343_v60  ;;  %v387_v2 = vsel %vm283_vm0, %v367_v62, 0.0 }
  0xaa   : > { %v1181_v1 = vsub.f32 %v1103_v13, %v344_v61  ;;  %409 = vadd.xlane.f32.xlu1 %v408_v59  ;;  %388 = vadd.xlane.f32.xlu0 %v387_v2  ;;  %v298_v3 = vpop.xlane.xlu0 %297  ;;  %v390_v5 = vsel %vm283_vm0, %v368_v63, 0.0 }
  0xab   : > { %v301_v4 = vpop.xlane.xlu1 %300  ;;  %v337_v6 = vmul.f32 0.03125, %v298_v3  ;;  %v375_v8 = vmul.f32 %v1178_v0, %v1178_v0 }
  0xac   : > { %v338_v7 = vmul.f32 0.03125, %v301_v4  ;;  %v376_v9 = vmul.f32 %v1181_v1, %v1181_v1 }
  0xad   : > { %v1190_v10 = vsub.f32 %v1110_v16, %v337_v6  ;;  %v411_v12 = vsel %vm283_vm0, %v375_v8, 0.0 }
  0xae   : > { %v1193_v11 = vsub.f32 %v1113_v17, %v338_v7  ;;  %391 = vadd.xlane.f32.xlu1 %v390_v5  ;;  %412 = vadd.xlane.f32.xlu0 %v411_v12  ;;  %v322_v13 = vpop.xlane.xlu0 %321  ;;  %v414_v15 = vsel %vm283_vm0, %v376_v9, 0.0 }
  0xaf   : > { %v325_v14 = vpop.xlane.xlu1 %324  ;;  %v345_v18 = vmul.f32 0.03125, %v322_v13  ;;  %v369_v22 = vmul.f32 %v1190_v10, %v1190_v10 }
  0xb0   : > { %v346_v19 = vmul.f32 0.03125, %v325_v14  ;;  %v370_v16 = vmul.f32 %v1193_v11, %v1193_v11 }
  0xb1   : > { %v1202_v23 = vsub.f32 %v1120_v20, %v345_v18  ;;  %v393_v26 = vsel %vm283_vm0, %v369_v22, 0.0 }
  0xb2   : > { %v1205_v17 = vsub.f32 %v1123_v21, %v346_v19  ;;  %415 = vadd.xlane.f32.xlu1 %v414_v15  ;;  %394 = vadd.xlane.f32.xlu0 %v393_v26  ;;  %v304_v27 = vpop.xlane.xlu0 %303  ;;  %v396_v31 = vsel %vm283_vm0, %v370_v16, 0.0 }
  0xb3   : > { %v307_v30 = vpop.xlane.xlu1 %306  ;;  %v339_v32 = vmul.f32 0.03125, %v304_v27  ;;  %v377_v34 = vmul.f32 %v1202_v23, %v1202_v23 }
  0xb4   : > { %v340_v33 = vmul.f32 0.03125, %v307_v30  ;;  %v378_v20 = vmul.f32 %v1205_v17, %v1205_v17 }
  0xb5   : > { %v1214_v35 = vsub.f32 %v1130_v24, %v339_v32  ;;  %v417_v38 = vsel %vm283_vm0, %v377_v34, 0.0  ;;  %v1248_v32 = vld [vmem:[%s1380_s1] ss:$0 sm:$0xff] }
  0xb6   : > { %v1217_v21 = vsub.f32 %v1133_v25, %v340_v33  ;;  %397 = vadd.xlane.f32.xlu1 %v396_v31  ;;  %418 = vadd.xlane.f32.xlu0 %v417_v38  ;;  %v328_v39 = vpop.xlane.xlu0 %327  ;;  %v420_v41 = vsel %vm283_vm0, %v378_v20, 0.0 }
  0xb7   : > { %v331_v40 = vpop.xlane.xlu1 %330  ;;  %v347_v42 = vmul.f32 0.03125, %v328_v39  ;;  %v371_v46 = vmul.f32 %v1214_v35, %v1214_v35 }
  0xb8   : > { %v348_v43 = vmul.f32 0.03125, %v331_v40  ;;  %v372_v24 = vmul.f32 %v1217_v21, %v1217_v21 }
  0xb9   : > { %v1226_v47 = vsub.f32 %v1140_v28, %v347_v42  ;;  %v399_v48 = vsel %vm283_vm0, %v371_v46, 0.0 }
  0xba   : > { %v1229_v25 = vsub.f32 %v1143_v29, %v348_v43  ;;  %421 = vadd.xlane.f32.xlu1 %v420_v41  ;;  %400 = vadd.xlane.f32.xlu0 %v399_v48  ;;  %v402_v49 = vsel %vm283_vm0, %v372_v24, 0.0  ;;  %v973_v29 = vld [vmem:[%s1382_s3 + $0x8] sm:$0xff]   ;;  %v1255_v24 = vld [vmem:[%s1381_s2] ss:$0 sm:$0xff] }
  0xbb   : > { %v379_v50 = vmul.f32 %v1226_v47, %v1226_v47  ;;  %925 = vmatprep.subr.bf16.mxu0 %v973_v29  ;;  %945 = vmatprep.subr.bf16.mxu1 %v973_v29 }
  0xbc   : > { %v380_v51 = vmul.f32 %v1229_v25, %v1229_v25  ;;  %926 = vmatpush3.bf16.msra.mxu0 %v973_v29  ;;  %947 = vmatpush3.bf16.msra.mxu1 %v973_v29 }
  0xbd   : > { %v423_v52 = vsel %vm283_vm0, %v379_v50, 0.0  ;;  %927 = vmatprep.subr.bf16.mxu0 %v974_v53  ;;  %946 = vmatprep.subr.bf16.mxu1 %v974_v53 }
  0xbe   : > { %403 = vadd.xlane.f32.xlu1 %v402_v49  ;;  %424 = vadd.xlane.f32.xlu0 %v423_v52  ;;  %v426_v28 = vsel %vm283_vm0, %v380_v51, 0.0 }
  0xc0   : > { %928 = vmatpush3.bf16.msra.mxu0 %v974_v53  ;;  %948 = vmatpush3.bf16.msra.mxu1 %v974_v53 }
  0xc2   : > { %427 = vadd.xlane.f32.xlu1 %v426_v28 }
 0x12b   : > { %v383_v56 = vpop.xlane.xlu0 %382 }
 0x12c   : > { %v429_v57 = vmul.f32 0.03125, %v383_v56 }
 0x12e   : > { %v445_v58 = vadd.f32 1e-12, %v429_v57 }
 0x12f   : > { %v386_v59 = vpop.xlane.xlu1 %385  ;;  %v407_v60 = vpop.xlane.xlu0 %406 }
 0x130   : > { %975 = vrsqrt.f32 %v445_v58  ;;  %v430_v61 = vmul.f32 0.03125, %v386_v59  ;;  %v437_v62 = vmul.f32 0.03125, %v407_v60 }
 0x132   : > { %v446_v63 = vadd.f32 1e-12, %v430_v61  ;;  %v453_v2 = vadd.f32 1e-12, %v437_v62 }
 0x133   : > { %v410_v3 = vpop.xlane.xlu1 %409  ;;  %v389_v4 = vpop.xlane.xlu0 %388 }
 0x134   : > { %977 = vrsqrt.f32 %v446_v63  ;;  %v438_v5 = vmul.f32 0.03125, %v410_v3  ;;  %v431_v6 = vmul.f32 0.03125, %v389_v4 }
 0x135   : > { %979 = vrsqrt.f32 %v453_v2 }
 0x136   : > { %v454_v7 = vadd.f32 1e-12, %v438_v5  ;;  %v447_v8 = vadd.f32 1e-12, %v431_v6 }
 0x137   : > { %v392_v9 = vpop.xlane.xlu1 %391  ;;  %v413_v12 = vpop.xlane.xlu0 %412 }
 0x138   : > { %981 = vrsqrt.f32 %v454_v7  ;;  %v432_v13 = vmul.f32 0.03125, %v392_v9  ;;  %v439_v14 = vmul.f32 0.03125, %v413_v12 }
 0x139   : > { %983 = vrsqrt.f32 %v447_v8 }
 0x13a   : > { %v448_v15 = vadd.f32 1e-12, %v432_v13  ;;  %v455_v18 = vadd.f32 1e-12, %v439_v14 }
 0x13b   : > { %v416_v19 = vpop.xlane.xlu1 %415  ;;  %v395_v22 = vpop.xlane.xlu0 %394 }
 0x13c   : > { %985 = vrsqrt.f32 %v448_v15  ;;  %v440_v16 = vmul.f32 0.03125, %v416_v19  ;;  %v433_v26 = vmul.f32 0.03125, %v395_v22 }
 0x13d   : > { %v976_v27 = vpop.eup %975  ;;  %987 = vrsqrt.f32 %v455_v18 }
 0x13e   : > { %v456_v30 = vadd.f32 1e-12, %v440_v16  ;;  %v449_v31 = vadd.f32 1e-12, %v433_v26  ;;  %v477_v33 = vmul.f32 %v976_v27, %v1149_v36 }
 0x13f   : > { %v398_v34 = vpop.xlane.xlu1 %397  ;;  %v419_v20 = vpop.xlane.xlu0 %418 }
 0x140   : > { %989 = vrsqrt.f32 %v456_v30  ;;  %v434_v38 = vmul.f32 0.03125, %v398_v34  ;;  %v441_v39 = vmul.f32 0.03125, %v419_v20  ;;  %v499_v41 = vmul.f32 %v1248_v32, %v477_v33 }
 0x141   : > { %v978_v40 = vpop.eup %977  ;;  %991 = vrsqrt.f32 %v449_v31 }
 0x142   : > { %v980_v42 = vpop.eup %979  ;;  %v450_v43 = vadd.f32 1e-12, %v434_v38  ;;  %v457_v46 = vadd.f32 1e-12, %v441_v39  ;;  %v478_v48 = vmul.f32 %v978_v40, %v1157_v44  ;;  %v521_v53 = vadd.f32 %v1255_v24, %v499_v41 }
 0x143   : > { %v422_v36 = vpop.xlane.xlu1 %421  ;;  %v401_v49 = vpop.xlane.xlu0 %400  ;;  %v485_v50 = vmul.f32 %v980_v42, %v1151_v37 }
 0x144   : > { %993 = vrsqrt.f32 %v450_v43  ;;  %v442_v51 = vmul.f32 0.03125, %v422_v36  ;;  %v435_v52 = vmul.f32 0.03125, %v401_v49  ;;  %v500_v28 = vmul.f32 %v1248_v32, %v478_v48 }
 0x145   : > { %v982_v29 = vpop.eup %981  ;;  %995 = vrsqrt.f32 %v457_v46  ;;  %v507_v37 = vmul.f32 %v1248_v32, %v485_v50 }
 0x146   : > { %v984_v56 = vpop.eup %983  ;;  %v458_v57 = vadd.f32 1e-12, %v442_v51  ;;  %v451_v58 = vadd.f32 1e-12, %v435_v52  ;;  %v522_v59 = vadd.f32 %v1255_v24, %v500_v28  ;;  %v486_v44 = vmul.f32 %v982_v29, %v1159_v45 }
 0x147   : > { %v404_v60 = vpop.xlane.xlu1 %403  ;;  %v425_v61 = vpop.xlane.xlu0 %424  ;;  %v479_v62 = vmul.f32 %v984_v56, %v1167_v54  ;;  %v529_v54 = vadd.f32 %v1255_v24, %v507_v37 }
 0x148   : > { %997 = vrsqrt.f32 %v458_v57  ;;  %v436_v63 = vmul.f32 0.03125, %v404_v60  ;;  %v443_v2 = vmul.f32 0.03125, %v425_v61  ;;  %v537_v3 = vpack.c.bf16 %v522_v59, %v521_v53 }
 0x149   : > { %v986_v4 = vpop.eup %985  ;;  %999 = vrsqrt.f32 %v451_v58  ;;  %v508_v5 = vmul.f32 %v1248_v32, %v486_v44  ;;  %v501_v6 = vmul.f32 %v1248_v32, %v479_v62 }
 0x14a   : > { %v988_v7 = vpop.eup %987  ;;  %v452_v8 = vadd.f32 1e-12, %v436_v63  ;;  %v459_v9 = vadd.f32 1e-12, %v443_v2  ;;  %929 = vmatprep.mubr.msk.bf16.mxu0 %vm283_vm0, %v537_v3  ;;  %v480_v45 = vmul.f32 %v986_v4, %v1169_v55  ;;  %v1314_v4 = vld [vmem:[%s1383_s4] ss:$0 sm:$0xff] }
 0x14b   : > { %v428_v12 = vpop.xlane.xlu1 %427  ;;  %v530_v13 = vadd.f32 %v1255_v24, %v508_v5  ;;  %v487_v14 = vmul.f32 %v988_v7, %v1178_v0  ;;  %v523_v16 = vadd.f32 %v1255_v24, %v501_v6 }
 0x14c   : > { %1001 = vrsqrt.f32 %v452_v8  ;;  %v444_v15 = vmul.f32 0.03125, %v428_v12  ;;  %v502_v18 = vmul.f32 %v1248_v32, %v480_v45 }
 0x14d   : > { %v990_v19 = vpop.eup %989  ;;  %1003 = vrsqrt.f32 %v459_v9  ;;  %v541_v22 = vpack.c.bf16 %v530_v13, %v529_v54  ;;  %v509_v31 = vmul.f32 %v1248_v32, %v487_v14 }
 0x14e   : > { %v992_v26 = vpop.eup %991  ;;  %v460_v27 = vadd.f32 1e-12, %v444_v15  ;;  %v524_v55 = vadd.f32 %v1255_v24, %v502_v18  ;;  %v488_v30 = vmul.f32 %v990_v19, %v1181_v1 }
 0x14f   : > { %937 = vmatprep.mubr.msk.bf16.mxu1 %vm283_vm0, %v541_v22  ;;  %v481_v0 = vmul.f32 %v992_v26, %v1190_v10  ;;  %v531_v39 = vadd.f32 %v1255_v24, %v509_v31 }
 0x150   : > { %1005 = vrsqrt.f32 %v460_v27  ;;  %v538_v33 = vpack.c.bf16 %v524_v55, %v523_v16  ;;  %v510_v34 = vmul.f32 %v1248_v32, %v488_v30 }
 0x151   : > { %v994_v20 = vpop.eup %993  ;;  %v503_v41 = vmul.f32 %v1248_v32, %v481_v0 }
 0x152   : > { %v996_v38 = vpop.eup %995  ;;  %930 = vmatmul.mubr.msk.bf16.vlgmr.msra.gmra.mxu0 %vm283_vm0, %v538_v33  ;;  %v532_v40 = vadd.f32 %v1255_v24, %v510_v34  ;;  %v482_v1 = vmul.f32 %v994_v20, %v1193_v11 }
 0x153   : > { %v489_v42 = vmul.f32 %v996_v38, %v1202_v23  ;;  %v525_v36 = vadd.f32 %v1255_v24, %v503_v41 }
 0x154   : > { %v542_v43 = vpack.c.bf16 %v532_v40, %v531_v39  ;;  %v504_v10 = vmul.f32 %v1248_v32, %v482_v1 }
 0x155   : > { %v998_v46 = vpop.eup %997  ;;  %v511_v51 = vmul.f32 %v1248_v32, %v489_v42 }
 0x156   : > { %v1000_v48 = vpop.eup %999  ;;  %938 = vmatmul.mubr.msk.bf16.vlgmr.msra.gmra.mxu1 %vm283_vm0, %v542_v43  ;;  %v526_v49 = vadd.f32 %v1255_v24, %v504_v10  ;;  %v490_v50 = vmul.f32 %v998_v46, %v1205_v17 }
 0x157   : > { %v483_v11 = vmul.f32 %v1000_v48, %v1214_v35  ;;  %v533_v53 = vadd.f32 %v1255_v24, %v511_v51 }
 0x158   : > { %v539_v52 = vpack.c.bf16 %v526_v49, %v525_v36  ;;  %v512_v23 = vmul.f32 %v1248_v32, %v490_v50 }
 0x159   : > { %v1002_v28 = vpop.eup %1001  ;;  %v505_v58 = vmul.f32 %v1248_v32, %v483_v11 }
 0x15a   : > { %v1004_v29 = vpop.eup %1003  ;;  %933 = vmatprep.mubr.msk.bf16.mxu0 %vm283_vm0, %v539_v52  ;;  %v534_v56 = vadd.f32 %v1255_v24, %v512_v23  ;;  %v484_v57 = vmul.f32 %v1002_v28, %v1217_v21 }
 0x15b   : > { %v491_v17 = vmul.f32 %v1004_v29, %v1226_v47  ;;  %v527_v60 = vadd.f32 %v1255_v24, %v505_v58 }
 0x15c   : > { %v543_v59 = vpack.c.bf16 %v534_v56, %v533_v53  ;;  %v506_v35 = vmul.f32 %v1248_v32, %v484_v57 }
 0x15d   : > { %v1006_v44 = vpop.eup %1005  ;;  %v513_v62 = vmul.f32 %v1248_v32, %v491_v17 }
 0x15e   : > { %941 = vmatprep.mubr.msk.bf16.mxu1 %vm283_vm0, %v543_v59  ;;  %v528_v61 = vadd.f32 %v1255_v24, %v506_v35  ;;  %v492_v37 = vmul.f32 %v1006_v44, %v1229_v25 }
 0x15f   : > { %v535_v47 = vadd.f32 %v1255_v24, %v513_v62 }
 0x160   : > { %v540_v21 = vpack.c.bf16 %v528_v61, %v527_v60  ;;  %v514_v63 = vmul.f32 %v1248_v32, %v492_v37 }
 0x162   : > { %934 = vmatmul.mubr.msk.bf16.gmra.mxu0 %vm283_vm0, %v540_v21  ;;  %v536_v2 = vadd.f32 %v1255_v24, %v514_v63 }
 0x164   : > { %v544_v3 = vpack.c.bf16 %v536_v2, %v535_v47 }
 0x166   : > { %942 = vmatmul.mubr.msk.bf16.gmra.mxu1 %vm283_vm0, %v544_v3 }
 0x212   : > { %v931_v25 = vpop.f32.mrf.mxu0 }
 0x213   : > { %v635_v5 = vadd.f32 %v931_v25, %v1314_v4 }
 0x214   : > { %v626_v32 = vpop.f32.mrf.mxu0 }
 0x215   : > { %v901_v24 = vpack.c.bf16 %v635_v5, %v635_v5  ;;  %v627_v6 = vadd.f32 %v1314_v4, %v626_v32 }
 0x216   : > { %v932_v7 = vpop.f32.mrf.mxu0  ;;  %v939_v8 = vpop.f32.mrf.mxu1 }
 0x217   : > { %756 = vst.msk [vmem:[%s1321_s14 + $0x8] sm:$0xf] %vm753_vm1, %v901_v24  ;;  %v899_v9 = vpack.c.bf16 %v627_v6, %v627_v6  ;;  %v638_v45 = vadd.f32 %v932_v7, %v1314_v4  ;;  %v667_v12 = vadd.f32 %v939_v8, %v1314_v4 }
 0x218   : > { %v629_v54 = vpop.f32.mrf.mxu0  ;;  %v658_v13 = vpop.f32.mrf.mxu1 }
 0x219   : > { %754 = vst.msk [vmem:[%s1321_s14] sm:$0xf] %vm753_vm1, %v899_v9  ;;  %v902_v14 = vpack.c.bf16 %v638_v45, %v638_v45  ;;  %v909_v15 = vpack.c.bf16 %v667_v12, %v667_v12  ;;  %v630_v18 = vadd.f32 %v1314_v4, %v629_v54  ;;  %v659_v19 = vadd.f32 %v1314_v4, %v658_v13 }
 0x21a   : > { %v940_v22 = vpop.f32.mrf.mxu1 }
 0x21b   : > { %757 = vst.msk [vmem:[%s1321_s14 + $0xc] sm:$0xf] %vm753_vm1, %v902_v14  ;;  %764 = vst.msk [vmem:[%s1321_s14 + $0x28] sm:$0xf] %vm753_vm1, %v909_v15  ;;  %v900_v16 = vpack.c.bf16 %v630_v18, %v630_v18  ;;  %v907_v26 = vpack.c.bf16 %v659_v19, %v659_v19  ;;  %v670_v27 = vadd.f32 %v940_v22, %v1314_v4 }
 0x21c   : > { %v661_v55 = vpop.f32.mrf.mxu1 }
 0x21d   : > { %755 = vst.msk [vmem:[%s1321_s14 + $0x4] sm:$0xf] %vm753_vm1, %v900_v16  ;;  %762 = vst.msk [vmem:[%s1321_s14 + $0x20] sm:$0xf] %vm753_vm1, %v907_v26  ;;  %v910_v30 = vpack.c.bf16 %v670_v27, %v670_v27  ;;  %v662_v31 = vadd.f32 %v1314_v4, %v661_v55 }
 0x21f   : > { %765 = vst.msk [vmem:[%s1321_s14 + $0x2c] sm:$0xf] %vm753_vm1, %v910_v30  ;;  %v908_v0 = vpack.c.bf16 %v662_v31, %v662_v31 }
 0x221   : > { %763 = vst.msk [vmem:[%s1321_s14 + $0x24] sm:$0xf] %vm753_vm1, %v908_v0 }
 0x222   : > { %v935_v33 = vpop.f32.mrf.mxu0 }
 0x223   : > { %v651_v34 = vadd.f32 %v935_v33, %v1314_v4 }
 0x224   : > { %v642_v20 = vpop.f32.mrf.mxu0 }
 0x225   : > { %v905_v38 = vpack.c.bf16 %v651_v34, %v651_v34  ;;  %v643_v39 = vadd.f32 %v1314_v4, %v642_v20 }
 0x226   : > { %v936_v40 = vpop.f32.mrf.mxu0  ;;  %v943_v1 = vpop.f32.mrf.mxu1 }
 0x227   : > { %760 = vst.msk [vmem:[%s1321_s14 + $0x18] sm:$0xf] %vm753_vm1, %v905_v38  ;;  %v903_v41 = vpack.c.bf16 %v643_v39, %v643_v39  ;;  %v654_v42 = vadd.f32 %v936_v40, %v1314_v4  ;;  %v683_v43 = vadd.f32 %v943_v1, %v1314_v4 }
 0x228   : > { %v645_v10 = vpop.f32.mrf.mxu0  ;;  %v674_v46 = vpop.f32.mrf.mxu1 }
 0x229   : > { %758 = vst.msk [vmem:[%s1321_s14 + $0x10] sm:$0xf] %vm753_vm1, %v903_v41  ;;  %v906_v48 = vpack.c.bf16 %v654_v42, %v654_v42  ;;  %v913_v36 = vpack.c.bf16 %v683_v43, %v683_v43  ;;  %v646_v49 = vadd.f32 %v1314_v4, %v645_v10  ;;  %v675_v50 = vadd.f32 %v1314_v4, %v674_v46 }
 0x22a   : > { %v944_v51 = vpop.f32.mrf.mxu1 }
 0x22b   : > { %761 = vst.msk [vmem:[%s1321_s14 + $0x1c] sm:$0xf] %vm753_vm1, %v906_v48  ;;  %768 = vst.msk [vmem:[%s1321_s14 + $0x38] sm:$0xf] %vm753_vm1, %v913_v36  ;;  %v904_v11 = vpack.c.bf16 %v646_v49, %v646_v49  ;;  %v911_v52 = vpack.c.bf16 %v675_v50, %v675_v50  ;;  %v686_v23 = vadd.f32 %v944_v51, %v1314_v4 }
 0x22c   : > { %v677_v28 = vpop.f32.mrf.mxu1 }
 0x22d   : > { %759 = vst.msk [vmem:[%s1321_s14 + $0x14] sm:$0xf] %vm753_vm1, %v904_v11  ;;  %766 = vst.msk [vmem:[%s1321_s14 + $0x30] sm:$0xf] %vm753_vm1, %v911_v52  ;;  %v914_v29 = vpack.c.bf16 %v686_v23, %v686_v23  ;;  %v678_v53 = vadd.f32 %v1314_v4, %v677_v28 }
 0x22f   : > { %769 = vst.msk [vmem:[%s1321_s14 + $0x3c] sm:$0xf] %vm753_vm1, %v914_v29  ;;  %v912_v56 = vpack.c.bf16 %v678_v53, %v678_v53 }
 0x231   : > { %767 = vst.msk [vmem:[%s1321_s14 + $0x34] sm:$0xf] %vm753_vm1, %v912_v56 }
 0x232 PF: > { %s15_s20 = sadd.s32 1, %s1029_s20   ;;  %s1385_s18 = smov %s1025_s19 }
 0x233   : > { %p12_p5 = scmp.ge.s32.totalorder %s15_s20, 4   ;;  %s1386_s19 = smov %s1388_s21 }
 0x235   :  { %14 = sbr.rel (!%p12_p5) target bundleno = 2 (0x2), region = 70 }

</bundles_post_ra>
